<compile_context>
chip_gen: v7x
topology: tpu7x:2x2x1
jax: 0.10.0
libtpu: 0.0.40
codegen_flags: <defaults>
</compile_context>

<pallas_src>
import functools
import math

import jax
import jax.numpy as jnp
from jax.experimental import pallas as pl
from jax.experimental.pallas import tpu as pltpu


def mlp_kernel(xT_ref, w1_ref, b1_ref, w2_ref, b2_ref, w3_ref, b3_ref,
               w4_ref, b4_ref, o_ref, *, use_bf16):
    # Activations are (features, TB): batch on the lane axis.
    cast = (lambda a: a.astype(jnp.bfloat16)) if use_bf16 else (lambda a: a)

    x = xT_ref[...]                                                   # (5, TB) f32
    h = jnp.dot(cast(w1_ref[...]), cast(x),
                preferred_element_type=jnp.float32) + b1_ref[...]     # (64, TB)
    h = jnp.maximum(h, 0.0)
    h = jnp.dot(cast(w2_ref[...]), cast(h),
                preferred_element_type=jnp.float32) + b2_ref[...]     # (32, TB)
    h = jnp.maximum(h, 0.0)
    h = jnp.dot(cast(w3_ref[...]), cast(h),
                preferred_element_type=jnp.float32) + b3_ref[...]     # (16, TB)
    h = jnp.maximum(h, 0.0)

    # Final Linear(16, 1): VPU multiply + sublane reduce (frees the MXU slot),
    # kept in f32.
    o = jnp.sum(w4_ref[...] * h, axis=0, keepdims=True) + b4_ref[...]  # (1, TB)
    o_ref[...] = o.astype(o_ref.dtype)


def _round_up(n, m):
    return ((n + m - 1) // m) * m


@functools.partial(jax.jit, static_argnames=("block_b", "use_bf16"))
def _mlp_pallas(x, params, *, block_b, use_bf16):
    B = x.shape[0]
    # Tile size: multiple of 128 lanes, never larger than needed.
    TB = min(block_b, _round_up(B, 128))
    num_tiles = (B + TB - 1) // TB
    B_pad = num_tiles * TB

    # Lane-dense layout: features on sublanes, batch on lanes (layout plumbing
    # done once in the wrapper).
    xT = x.T                                                          # (5, B)
    if B_pad != B:
        xT = jnp.pad(xT, ((0, 0), (0, B_pad - B)))

    w1, w2, w3 = params["w1"], params["w2"], params["w3"]             # (out, in)
    b1 = params["b1"].reshape(-1, 1)                                  # (64, 1)
    b2 = params["b2"].reshape(-1, 1)                                  # (32, 1)
    b3 = params["b3"].reshape(-1, 1)                                  # (16, 1)
    w4c = params["w4"].reshape(-1, 1)                                 # (16, 1)
    b4 = params["b4"].reshape(1, 1)                                   # (1, 1)

    # Weights/biases: full-array blocks with constant index_map -> revisited
    # blocks, DMA'd once and kept resident in VMEM across the batch grid.
    resident = lambda a: pl.BlockSpec(a.shape, lambda i: (0, 0))

    out = pl.pallas_call(
        functools.partial(mlp_kernel, use_bf16=use_bf16),
        out_shape=jax.ShapeDtypeStruct((1, B_pad), jnp.float32),
        grid=(num_tiles,),
        in_specs=[
            pl.BlockSpec((5, TB), lambda i: (0, i)),      # x tile (pipelined)
            resident(w1), resident(b1),
            resident(w2), resident(b2),
            resident(w3), resident(b3),
            resident(w4c), resident(b4),
        ],
        out_specs=pl.BlockSpec((1, TB), lambda i: (0, i)),  # lane-dense output slab
        compiler_params=pltpu.CompilerParams(
            dimension_semantics=("parallel",),              # megacore on v7x
            vmem_limit_bytes=32 * 1024 * 1024,
        ),
    )(xT, w1, b1, w2, b2, w3, b3, w4c, b4)

    return out[:, :B].reshape(B, 1)


def mlp_forward(x, params, *, block_b=1024, use_bf16=False,
                min_kernel_batch=0, force_kernel=False):
    """x: (B, 5) f32. params in PyTorch layout: w_i (out, in), b_i (out,)."""
    B = x.shape[0]
    if B < min_kernel_batch and not force_kernel:
        # At tiny batches the kernel is pure launch overhead; use plain XLA.
        return mlp_reference(x, params)
    return _mlp_pallas(x, params, block_b=block_b, use_bf16=use_bf16)


def mlp_reference(x, params):
    h = x
    for i in range(1, 4):
        h = jnp.maximum(h @ params[f"w{i}"].T + params[f"b{i}"], 0.0)
    return h @ params["w4"].T + params["b4"]


def init_params(key):
    """PyTorch nn.Linear-style init: w (out, in), b (out,), U(-1/sqrt(in), 1/sqrt(in))."""
    dims = [(5, 64), (64, 32), (32, 16), (16, 1)]
    params = {}
    for i, (fan_in, fan_out) in enumerate(dims, start=1):
        key, kw, kb = jax.random.split(key, 3)
        bound = 1.0 / math.sqrt(fan_in)
        params[f"w{i}"] = jax.random.uniform(kw, (fan_out, fan_in), jnp.float32,
                                             -bound, bound)
        params[f"b{i}"] = jax.random.uniform(kb, (fan_out,), jnp.float32,
                                             -bound, bound)
    return params


if __name__ == "__main__":
    key = jax.random.PRNGKey(0)
    key, kx = jax.random.split(key)
    params = init_params(key)

    # Small example batch consistent with the module's (B, 5) input.
    B = 8
    x = jax.random.normal(kx, (B, 5), jnp.float32)

    out = jax.block_until_ready(
        mlp_forward(x, params, use_bf16=False, force_kernel=True))
    ref = mlp_reference(x, params)
    assert out.shape == (B, 1), out.shape
    assert jnp.allclose(out, ref, atol=1e-3, rtol=1e-3), "kernel mismatch vs reference"

    print("KERNEL_OK")
</pallas_src>

<mosaic_0001>
module attributes {stable_mosaic.version = 11 : i64} {
  func.func @mlp_kernel(%arg0: i32, %arg1: memref<5x128xf32, #tpu.memory_space<vmem>>, %arg2: memref<64x5xf32, #tpu.memory_space<vmem>>, %arg3: memref<64x1xf32, #tpu.memory_space<vmem>>, %arg4: memref<32x64xf32, #tpu.memory_space<vmem>>, %arg5: memref<32x1xf32, #tpu.memory_space<vmem>>, %arg6: memref<16x32xf32, #tpu.memory_space<vmem>>, %arg7: memref<16x1xf32, #tpu.memory_space<vmem>>, %arg8: memref<16x1xf32, #tpu.memory_space<vmem>>, %arg9: memref<1x1xf32, #tpu.memory_space<vmem>>, %arg10: memref<1x128xf32, #tpu.memory_space<vmem>>) attributes {dimension_semantics = [#tpu.dimension_semantics<parallel>], iteration_bounds = array<i64: 1>, scalar_prefetch = 0 : i64, scratch_operands = 0 : i64, tpu.core_type = #tpu.core_type<tc>, window_params = [{transform_indices = @transform_0, window_bounds = array<i64: 5, 128>}, {pipeline_mode = #tpu.pipeline_mode<synchronous>, transform_indices = @transform_1, window_bounds = array<i64: 64, 5>}, {pipeline_mode = #tpu.pipeline_mode<synchronous>, transform_indices = @transform_2, window_bounds = array<i64: 64, 1>}, {pipeline_mode = #tpu.pipeline_mode<synchronous>, transform_indices = @transform_3, window_bounds = array<i64: 32, 64>}, {pipeline_mode = #tpu.pipeline_mode<synchronous>, transform_indices = @transform_4, window_bounds = array<i64: 32, 1>}, {pipeline_mode = #tpu.pipeline_mode<synchronous>, transform_indices = @transform_5, window_bounds = array<i64: 16, 32>}, {pipeline_mode = #tpu.pipeline_mode<synchronous>, transform_indices = @transform_6, window_bounds = array<i64: 16, 1>}, {pipeline_mode = #tpu.pipeline_mode<synchronous>, transform_indices = @transform_7, window_bounds = array<i64: 16, 1>}, {pipeline_mode = #tpu.pipeline_mode<synchronous>, transform_indices = @transform_8, window_bounds = array<i64: 1, 1>}, {transform_indices = @transform_9, window_bounds = array<i64: 1, 128>}]} {
    %c0 = arith.constant 0 : index
    %c0_0 = arith.constant 0 : index
    %0 = vector.load %arg1[%c0, %c0_0] : memref<5x128xf32, #tpu.memory_space<vmem>>, vector<5x128xf32>
    %c0_1 = arith.constant 0 : index
    %c0_2 = arith.constant 0 : index
    %1 = vector.load %arg2[%c0_1, %c0_2] : memref<64x5xf32, #tpu.memory_space<vmem>>, vector<64x5xf32>
    %cst = arith.constant dense<0.000000e+00> : vector<64x128xf32>
    %2 = tpu.matmul %1, %0, %cst {dimension_numbers = #tpu.dot_dimension_numbers<[1], [0], [0], [1], [0, 0, 1, 1], [], []>} : vector<64x5xf32>, vector<5x128xf32>, vector<64x128xf32> -> vector<64x128xf32>
    %c0_3 = arith.constant 0 : index
    %c0_4 = arith.constant 0 : index
    %3 = vector.load %arg3[%c0_3, %c0_4] : memref<64x1xf32, #tpu.memory_space<vmem>>, vector<64x1xf32>
    %4 = vector.broadcast %3 : vector<64x1xf32> to vector<64x128xf32>
    %5 = arith.addf %2, %4 : vector<64x128xf32>
    %cst_5 = arith.constant 0.000000e+00 : f32
    %6 = vector.broadcast %cst_5 : f32 to vector<64x128xf32>
    %7 = arith.maximumf %5, %6 : vector<64x128xf32>
    %c0_6 = arith.constant 0 : index
    %c0_7 = arith.constant 0 : index
    %8 = vector.load %arg4[%c0_6, %c0_7] : memref<32x64xf32, #tpu.memory_space<vmem>>, vector<32x64xf32>
    %cst_8 = arith.constant dense<0.000000e+00> : vector<32x128xf32>
    %9 = tpu.matmul %8, %7, %cst_8 {dimension_numbers = #tpu.dot_dimension_numbers<[1], [0], [0], [1], [0, 0, 1, 1], [], []>} : vector<32x64xf32>, vector<64x128xf32>, vector<32x128xf32> -> vector<32x128xf32>
    %c0_9 = arith.constant 0 : index
    %c0_10 = arith.constant 0 : index
    %10 = vector.load %arg5[%c0_9, %c0_10] : memref<32x1xf32, #tpu.memory_space<vmem>>, vector<32x1xf32>
    %11 = vector.broadcast %10 : vector<32x1xf32> to vector<32x128xf32>
    %12 = arith.addf %9, %11 : vector<32x128xf32>
    %cst_11 = arith.constant 0.000000e+00 : f32
    %13 = vector.broadcast %cst_11 : f32 to vector<32x128xf32>
    %14 = arith.maximumf %12, %13 : vector<32x128xf32>
    %c0_12 = arith.constant 0 : index
    %c0_13 = arith.constant 0 : index
    %15 = vector.load %arg6[%c0_12, %c0_13] : memref<16x32xf32, #tpu.memory_space<vmem>>, vector<16x32xf32>
    %cst_14 = arith.constant dense<0.000000e+00> : vector<16x128xf32>
    %16 = tpu.matmul %15, %14, %cst_14 {dimension_numbers = #tpu.dot_dimension_numbers<[1], [0], [0], [1], [0, 0, 1, 1], [], []>} : vector<16x32xf32>, vector<32x128xf32>, vector<16x128xf32> -> vector<16x128xf32>
    %c0_15 = arith.constant 0 : index
    %c0_16 = arith.constant 0 : index
    %17 = vector.load %arg7[%c0_15, %c0_16] : memref<16x1xf32, #tpu.memory_space<vmem>>, vector<16x1xf32>
    %18 = vector.broadcast %17 : vector<16x1xf32> to vector<16x128xf32>
    %19 = arith.addf %16, %18 : vector<16x128xf32>
    %cst_17 = arith.constant 0.000000e+00 : f32
    %20 = vector.broadcast %cst_17 : f32 to vector<16x128xf32>
    %21 = arith.maximumf %19, %20 : vector<16x128xf32>
    %c0_18 = arith.constant 0 : index
    %c0_19 = arith.constant 0 : index
    %22 = vector.load %arg8[%c0_18, %c0_19] : memref<16x1xf32, #tpu.memory_space<vmem>>, vector<16x1xf32>
    %23 = vector.broadcast %22 : vector<16x1xf32> to vector<16x128xf32>
    %24 = arith.mulf %23, %21 : vector<16x128xf32>
    %cst_20 = arith.constant dense<0.000000e+00> : vector<128xf32>
    %25 = vector.multi_reduction <add>, %24, %cst_20 [0] : vector<16x128xf32> to vector<128xf32>
    %26 = vector.shape_cast %25 : vector<128xf32> to vector<1x128xf32>
    %c0_21 = arith.constant 0 : index
    %c0_22 = arith.constant 0 : index
    %27 = vector.load %arg9[%c0_21, %c0_22] : memref<1x1xf32, #tpu.memory_space<vmem>>, vector<1x1xf32>
    %28 = vector.broadcast %27 : vector<1x1xf32> to vector<1x128xf32>
    %29 = arith.addf %26, %28 : vector<1x128xf32>
    %c0_23 = arith.constant 0 : index
    %c0_24 = arith.constant 0 : index
    %30 = vector.load %arg10[%c0_23, %c0_24] : memref<1x128xf32, #tpu.memory_space<vmem>>, vector<1x128xf32>
    tpu.vector_store %arg10[%c0_23, %c0_24], %29 {strides = array<i32>} : memref<1x128xf32, #tpu.memory_space<vmem>>, vector<1x128xf32>,
    return
  }
  func.func @transform_0(%arg0: i32) -> (i32, i32) {
    %c0_i32 = arith.constant 0 : i32
    %c0_i32_0 = arith.constant 0 : i32
    return %c0_i32, %arg0 : i32, i32
  }
  func.func @transform_1(%arg0: i32) -> (i32, i32) {
    %c0_i32 = arith.constant 0 : i32
    %c0_i32_0 = arith.constant 0 : i32
    %c0_i32_1 = arith.constant 0 : i32
    return %c0_i32, %c0_i32_0 : i32, i32
  }
  func.func @transform_2(%arg0: i32) -> (i32, i32) {
    %c0_i32 = arith.constant 0 : i32
    %c0_i32_0 = arith.constant 0 : i32
    %c0_i32_1 = arith.constant 0 : i32
    return %c0_i32, %c0_i32_0 : i32, i32
  }
  func.func @transform_3(%arg0: i32) -> (i32, i32) {
    %c0_i32 = arith.constant 0 : i32
    %c0_i32_0 = arith.constant 0 : i32
    %c0_i32_1 = arith.constant 0 : i32
    return %c0_i32, %c0_i32_0 : i32, i32
  }
  func.func @transform_4(%arg0: i32) -> (i32, i32) {
    %c0_i32 = arith.constant 0 : i32
    %c0_i32_0 = arith.constant 0 : i32
    %c0_i32_1 = arith.constant 0 : i32
    return %c0_i32, %c0_i32_0 : i32, i32
  }
  func.func @transform_5(%arg0: i32) -> (i32, i32) {
    %c0_i32 = arith.constant 0 : i32
    %c0_i32_0 = arith.constant 0 : i32
    %c0_i32_1 = arith.constant 0 : i32
    return %c0_i32, %c0_i32_0 : i32, i32
  }
  func.func @transform_6(%arg0: i32) -> (i32, i32) {
    %c0_i32 = arith.constant 0 : i32
    %c0_i32_0 = arith.constant 0 : i32
    %c0_i32_1 = arith.constant 0 : i32
    return %c0_i32, %c0_i32_0 : i32, i32
  }
  func.func @transform_7(%arg0: i32) -> (i32, i32) {
    %c0_i32 = arith.constant 0 : i32
    %c0_i32_0 = arith.constant 0 : i32
    %c0_i32_1 = arith.constant 0 : i32
    return %c0_i32, %c0_i32_0 : i32, i32
  }
  func.func @transform_8(%arg0: i32) -> (i32, i32) {
    %c0_i32 = arith.constant 0 : i32
    %c0_i32_0 = arith.constant 0 : i32
    %c0_i32_1 = arith.constant 0 : i32
    return %c0_i32, %c0_i32_0 : i32, i32
  }
  func.func @transform_9(%arg0: i32) -> (i32, i32) {
    %c0_i32 = arith.constant 0 : i32
    %c0_i32_0 = arith.constant 0 : i32
    return %c0_i32, %arg0 : i32, i32
  }
}

</mosaic_0001>

<bundles_post_ra>
// kernel: _mlp_pallas.1
= control target key start
LH: loop header
LB: loop body
LE: loop exit
PB: predicated region body
PF: predicated region fallthrough
CT: control target
= control target key end

     0   :  { %vm116_vm0 = vcmask 1044480   ;;  %vm91_vm1 = vcmask 39936   ;;  %v614_v3 = vmov 0   ;;  %vm261_vm2 = vcmask 523264   ;;  %s780_s0 = inlined_call_operand.vmem [shape: f32[5,128], index: 0, kind: input, shape index: {}]   ;;  %s781_s1 = inlined_call_operand.vmem [shape: f32[64,5], index: 1, kind: input, shape index: {}]   ;;  %s782_s8 = inlined_call_operand.<no memory space> [shape: f32[1,1], index: 8, kind: input, shape index: {}]   ;;  %s783_s2 = inlined_call_operand.vmem [shape: f32[64,1], index: 2, kind: input, shape index: {}]   ;;  %s784_s4 = inlined_call_operand.vmem [shape: f32[32,1], index: 4, kind: input, shape index: {}]   ;;  %s785_s6 = inlined_call_operand.vmem [shape: f32[16,1], index: 6, kind: input, shape index: {}]   ;;  %s786_s7 = inlined_call_operand.vmem [shape: f32[16,1], index: 7, kind: input, shape index: {}]   ;;  %s787_s3 = inlined_call_operand.vmem [shape: f32[32,64], index: 3, kind: input, shape index: {}]   ;;  %s788_s5 = inlined_call_operand.vmem [shape: f32[16,32], index: 5, kind: input, shape index: {}]   ;;  %s789_s9 = inlined_call_operand.vmem [shape: f32[1,128], index: 9, kind: output, shape index: {}]  }
   0x1   :  { %v34_v0 = vld [vmem:[%s780_s0] sm:$0x1f]  ;;  %v36_v2 = vld [vmem:[%s781_s1 + $0x8] sm:$0xff]  ;;  %612 = vset.pattern.permute.xlu0 %v614_v3  ;;  %613 = vset.pattern.permute.xlu1 %v614_v3  ;;  %v14_v4 = vstv %s782_s8  ;;  %v37_v5 = vld [vmem:[%s781_s1 + $0x10] sm:$0xff]  ;;  %vm377_vm3 = vcmask 261120  }
   0x2   :  { %v35_v1 = vld [vmem:[%s781_s1] sm:$0xff]  ;;  %540 = vmatprep.subr.msk.mxu0 %vm116_vm0, %v34_v0  ;;  %15 = vst [vmem:[#allocation2] sm:$0x1] %v14_v4  ;;  %v45_v7 = vld [vmem:[%s783_s2 + $0x10] sm:$0xff]  ;;  %v38_v8 = vld [vmem:[%s781_s1 + $0x18] sm:$0xff] }
   0x3   :  { %542 = vmatprep.mubr.msk.f32.mxu0 %vm91_vm1, %v35_v1  ;;  %541 = vmatpush3.msk.msra.mxu0 %vm116_vm0, %v34_v0  ;;  %v43_v6 = vld [vmem:[%s783_s2] sm:$0xff]  ;;  %v44_v10 = vld [vmem:[%s783_s2 + $0x8] sm:$0xff]  ;;  %v46_v11 = vld [vmem:[%s783_s2 + $0x18] sm:$0xff] }
   0x4   :  { %543 = vmatmul.mubr.msk.f32.vlgmr.msra.gmra.mrb[0].mxu0 %vm91_vm1, %v36_v2  ;;  %53 = vperm.xlu0 %612, %v43_v6   ;;  %v39_v9 = vld [vmem:[%s781_s1 + $0x20] sm:$0xff]  ;;  %v40_v12 = vld [vmem:[%s781_s1 + $0x28] sm:$0xff]  ;;  %v41_v13 = vld [vmem:[%s781_s1 + $0x30] sm:$0xff] }
   0x5   :  { %545 = vmatprep.mubr.msk.f32.mxu0 %vm91_vm1, %v37_v5  ;;  %63 = vperm.xlu1 %613, %v45_v7   ;;  %v47_v14 = vld [vmem:[%s783_s2 + $0x20] sm:$0xff]  ;;  %v48_v15 = vld [vmem:[%s783_s2 + $0x28] sm:$0xff]  ;;  %v42_v16 = vld [vmem:[%s781_s1 + $0x38] sm:$0xff] }
   0x6   :  { %v49_v17 = vld [vmem:[%s783_s2 + $0x30] sm:$0xff]  ;;  %v50_v18 = vld [vmem:[%s783_s2 + $0x38] sm:$0xff]  ;;  %v237_v19 = vld [vmem:[%s784_s4] sm:$0xff] }
   0x7   :  { %v238_v20 = vld [vmem:[%s784_s4 + $0x8] sm:$0xff]  ;;  %v239_v21 = vld [vmem:[%s784_s4 + $0x10] sm:$0xff]  ;;  %v240_v22 = vld [vmem:[%s784_s4 + $0x18] sm:$0xff] }
   0x8   :  { %546 = vmatmul.mubr.msk.f32.gmra.mrb[2].mxu0 %vm91_vm1, %v38_v8  ;;  %58 = vperm.xlu0 %612, %v44_v10   ;;  %v365_v23 = vld [vmem:[%s785_s6] sm:$0xff]  ;;  %v366_v24 = vld [vmem:[%s785_s6 + $0x8] sm:$0xff]  ;;  %v235_v2 = vld [vmem:[%s787_s3 + $0x10] sm:$0xff] }
   0x9   :  { %548 = vmatprep.mubr.msk.f32.mxu0 %vm91_vm1, %v39_v9  ;;  %68 = vperm.xlu1 %613, %v46_v11   ;;  %v461_v25 = vld [vmem:[%s786_s7] sm:$0xff]  ;;  %v462_v26 = vld [vmem:[%s786_s7 + $0x8] sm:$0xff]  ;;  %v236_v3 = vld [vmem:[%s787_s3 + $0x18] sm:$0xff] }
   0xa   :  { %v482_v27 = vld [vmem:[#allocation2] sm:$0x1]  ;;  %v234_v1 = vld [vmem:[%s787_s3 + $0x8] sm:$0xff] }
   0xb   :  { %v233_v28 = vld [vmem:[%s787_s3] sm:$0xff] }
   0xc   :  { %549 = vmatmul.mubr.msk.f32.gmra.mrb[4].mxu0 %vm91_vm1, %v40_v12  ;;  %73 = vperm.xlu0 %612, %v47_v14   ;;  %v363_v4 = vld [vmem:[%s788_s5] sm:$0xff] }
   0xd   :  { %551 = vmatprep.mubr.msk.f32.mxu0 %vm91_vm1, %v41_v13  ;;  %78 = vperm.xlu1 %613, %v48_v15  }
   0xe   :  { %570 = vmatprep.mubr.msk.f32.mxu1 %vm261_vm2, %v233_v28 }
  0x10   :  { %552 = vmatmul.mubr.msk.f32.gmra.mrb[6].mxu0 %vm91_vm1, %v42_v16  ;;  %83 = vperm.xlu0 %612, %v49_v17  }
  0x11   :  { %88 = vperm.xlu1 %613, %v50_v18   ;;  %584 = vmatprep.mubr.msk.f32.mxu0 %vm377_vm3, %v363_v4 }
  0x14   :  { %243 = vperm.xlu0 %612, %v237_v19  }
  0x15   :  { %248 = vperm.xlu1 %613, %v238_v20  }
  0x18   :  { %253 = vperm.xlu0 %612, %v239_v21  }
  0x19   :  { %258 = vperm.xlu1 %613, %v240_v22  }
  0x1c   :  { %369 = vperm.xlu0 %612, %v365_v23   ;;  %v364_v23 = vld [vmem:[%s788_s5 + $0x8] sm:$0xff] }
  0x1d   :  { %374 = vperm.xlu1 %613, %v366_v24  }
  0x20   :  { %465 = vperm.xlu0 %612, %v461_v25  }
  0x21   :  { %470 = vperm.xlu1 %613, %v462_v26  }
  0x24   :  { %485 = vperm.xlu0 %612, %v482_v27  }
  0x83   :  { %v54_v29 = vpop.permute.xlu0 %53 }
  0x84   :  { %v64_v30 = vpop.permute.xlu1 %63 }
  0x87   :  { %v59_v31 = vpop.permute.xlu0 %58 }
  0x88   :  { %v69_v32 = vpop.permute.xlu1 %68 }
  0x8b   :  { %v74_v45 = vpop.permute.xlu0 %73 }
  0x8c   :  { %v79_v42 = vpop.permute.xlu1 %78 }
  0x8f   :  { %v84_v57 = vpop.permute.xlu0 %83 }
  0x90   :  { %v89_v54 = vpop.permute.xlu1 %88 }
  0x93   :  { %v244_v6 = vpop.permute.xlu0 %243 }
  0x94   :  { %v249_v5 = vpop.permute.xlu1 %248 }
  0x97   :  { %v254_v15 = vpop.permute.xlu0 %253 }
  0x98   :  { %v259_v12 = vpop.permute.xlu1 %258 }
  0x9b   :  { %v370_v25 = vpop.permute.xlu0 %369 }
  0x9c   :  { %v375_v24 = vpop.permute.xlu1 %374 }
  0xd7   :  { %v544_v33 = vpop.f32.mrb[0].mxu0 }
  0xd8   :  { %v192_v34 = vadd.f32 %v544_v33, %v59_v31  ;;  %v186_v35 = vpop.f32.mrb[1].mxu0  ;;  %v471_v31 = vpop.permute.xlu1 %470 }
  0xd9   :  { %v187_v36 = vadd.f32 %v186_v35, %v54_v29  ;;  %v466_v33 = vpop.permute.xlu0 %465 }
  0xda   :  { %v226_v37 = vmax.f32 %v192_v34, 0.0 }
  0xdb   :  { %v225_v38 = vmax.f32 %v187_v36, 0.0  ;;  %v547_v39 = vpop.f32.mrb[2].mxu0  ;;  %v488_v36 = vlaneseq }
  0xdc   :  { %v202_v40 = vadd.f32 %v547_v39, %v69_v32  ;;  %v196_v41 = vpop.f32.mrb[3].mxu0 }
  0xdd   :  { %v197_v43 = vadd.f32 %v196_v41, %v64_v30  ;;  %v587_v44 = vpack.c.bf16 %v226_v37, %v225_v38  ;;  %v489_v39 = vshrl.u32 %v488_v36, 7 }
  0xde   :  { %v228_v46 = vmax.f32 %v202_v40, 0.0 }
  0xdf   :  { %v227_v47 = vmax.f32 %v197_v43, 0.0  ;;  %v550_v48 = vpop.f32.mrb[4].mxu0  ;;  %588 = vmatprep.subr.bf16.mxu1 %v587_v44 }
  0xe0   :  { %v212_v49 = vadd.f32 %v550_v48, %v79_v42  ;;  %v206_v50 = vpop.f32.mrb[5].mxu0  ;;  %590 = vmatpush3.bf16.msra.mxu1 %v587_v44  ;;  %v490_v42 = vsub.s32 0, %v489_v39  ;;  %v486_v44 = vpop.permute.xlu0 %485 }
  0xe1   :  { %v591_v51 = vpack.c.bf16 %v228_v46, %v227_v47  ;;  %v207_v52 = vadd.f32 %v206_v50, %v74_v45 }
  0xe2   :  { %v230_v53 = vmax.f32 %v212_v49, 0.0  ;;  %v491_v46 = vrot.slane %v486_v44, %v490_v42 }
  0xe3   :  { %v229_v55 = vmax.f32 %v207_v52, 0.0  ;;  %v553_v56 = vpop.f32.mrb[6].mxu0  ;;  %592 = vmatprep.subr.bf16.mxu1 %v591_v51 }
  0xe4   :  { %v222_v58 = vadd.f32 %v553_v56, %v89_v54  ;;  %v216_v59 = vpop.f32.mrb[7].mxu0  ;;  %594 = vmatpush3.bf16.msra.mxu1 %v591_v51 }
  0xe5   :  { %v595_v60 = vpack.c.bf16 %v230_v53, %v229_v55  ;;  %v217_v61 = vadd.f32 %v216_v59, %v84_v57 }
  0xe6   :  { %v232_v62 = vmax.f32 %v222_v58, 0.0 }
  0xe7   :  { %v231_v63 = vmax.f32 %v217_v61, 0.0  ;;  %596 = vmatprep.subr.bf16.mxu1 %v595_v60 }
  0xe8   :  { %598 = vmatpush3.bf16.msra.mxu1 %v595_v60 }
  0xe9   :  { %v599_v0 = vpack.c.bf16 %v232_v62, %v231_v63 }
  0xeb   :  { %600 = vmatprep.subr.bf16.mxu1 %v599_v0 }
  0xec   :  { %602 = vmatpush3.bf16.msra.mxu1 %v599_v0 }
  0xef   :  { %571 = vmatmul.mubr.msk.f32.vlgmr.msra.gmra.mrb[0].mxu1 %vm261_vm2, %v234_v1 }
  0xf0   :  { %573 = vmatprep.mubr.msk.f32.mxu1 %vm261_vm2, %v235_v2 }
  0xf3   :  { %574 = vmatmul.mubr.msk.f32.gmra.mrb[2].mxu1 %vm261_vm2, %v236_v3 }
 0x1c2   :  { %v572_v7 = vpop.f32.mrb[0].mxu1 }
 0x1c3   :  { %v346_v8 = vadd.f32 %v572_v7, %v249_v5  ;;  %v340_v9 = vpop.f32.mrb[1].mxu1 }
 0x1c4   :  { %v341_v10 = vadd.f32 %v340_v9, %v244_v6 }
 0x1c5   :  { %v360_v11 = vmax.f32 %v346_v8, 0.0 }
 0x1c6   :  { %v359_v13 = vmax.f32 %v341_v10, 0.0  ;;  %v575_v14 = vpop.f32.mrb[2].mxu1 }
 0x1c7   :  { %v356_v16 = vadd.f32 %v575_v14, %v259_v12  ;;  %v350_v17 = vpop.f32.mrb[3].mxu1 }
 0x1c8   :  { %v603_v18 = vpack.c.bf16 %v360_v11, %v359_v13  ;;  %v351_v19 = vadd.f32 %v350_v17, %v254_v15 }
 0x1c9   :  { %v362_v20 = vmax.f32 %v356_v16, 0.0 }
 0x1ca   :  { %v361_v21 = vmax.f32 %v351_v19, 0.0  ;;  %604 = vmatprep.subr.bf16.mxu0 %v603_v18 }
 0x1cb   :  { %606 = vmatpush3.bf16.msra.mxu0 %v603_v18 }
 0x1cc   :  { %v607_v22 = vpack.c.bf16 %v362_v20, %v361_v21 }
 0x1ce   :  { %608 = vmatprep.subr.bf16.mxu0 %v607_v22 }
 0x1cf   :  { %610 = vmatpush3.bf16.msra.mxu0 %v607_v22 }
 0x1d2   :  { %585 = vmatmul.mubr.msk.f32.vlgmr.msra.gmra.mrb[8].mxu0 %vm377_vm3, %v364_v23 }
 0x2a5   :  { %v586_v26 = vpop.f32.mrb[8].mxu0 }
 0x2a6   :  { %v456_v27 = vadd.f32 %v586_v26, %v375_v24  ;;  %v450_v28 = vpop.f32.mrb[9].mxu0 }
 0x2a7   :  { %v451_v29 = vadd.f32 %v450_v28, %v370_v25 }
 0x2a8   :  { %v460_v30 = vmax.f32 %v456_v27, 0.0 }
 0x2a9   :  { %v459_v32 = vmax.f32 %v451_v29, 0.0 }
 0x2aa   :  { %v474_v34 = vmul.f32 %v471_v31, %v460_v30 }
 0x2ab   :  { %v473_v35 = vmul.f32 %v466_v33, %v459_v32 }
 0x2ad   :  { %v475_v37 = vadd.f32 %v474_v34, %v473_v35 }
 0x2af   :  { %v476_v38 = vrot.slane %v475_v37, 4 }
 0x2b1   :  { %v477_v40 = vadd.f32 %v476_v38, %v475_v37 }
 0x2b3   :  { %v478_v41 = vrot.slane %v477_v40, 2 }
 0x2b5   :  { %v479_v43 = vadd.f32 %v478_v41, %v477_v40 }
 0x2b7   :  { %v480_v45 = vrot.slane %v479_v43, 1 }
 0x2b9   :  { %v481_v47 = vadd.f32 %v480_v45, %v479_v43 }
 0x2bb   :  { %v492_v48 = vadd.f32 %v491_v46, %v481_v47 }
 0x2bd   :  { %493 = vst [vmem:[%s789_s9] sm:$0x1] %v492_v48 }

</bundles_post_ra>
